<compile_context>
chip_gen: v7x
topology: tpu7x:2x2x1
jax: 0.10.0
libtpu: 0.0.40
codegen_flags: <defaults>
</compile_context>

<pallas_src>
import jax
import jax.numpy as jnp
from jax import lax
from jax.experimental import pallas as pl
from jax.experimental.pallas import tpu as pltpu


_SMEM_SPEC = pl.BlockSpec(memory_space=pltpu.MemorySpace.SMEM)


# ------------------------------------------------------------------ kernels

def _logits_2class(x_ref, w_ref, b_ref):
    """Per-row logits for the 2-class FC, computed on the VPU/XLU (no MXU)."""
    x = x_ref[...].astype(jnp.float32)                                 # (TN, D)
    w = w_ref[...].astype(jnp.float32)                                 # (2,  D)
    l0 = jnp.sum(x * w[0:1, :], axis=-1, keepdims=True) + b_ref[0]     # (TN, 1)
    l1 = jnp.sum(x * w[1:2, :], axis=-1, keepdims=True) + b_ref[1]     # (TN, 1)
    return l0, l1


def _train_kernel(x_ref, w_ref, b_ref, lab_ref, out_ref):
    """Packed lane-dense output per row block:
       lane 0: score class 0        lane 3: per-row NLL (cross-entropy)
       lane 1: score class 1        lane 4: per-row correct (0/1)
       lane 2: predLabel            lanes 5..127: zero
    """
    tn = x_ref.shape[0]
    l0, l1 = _logits_2class(x_ref, w_ref, b_ref)

    # numerically-stable 2-class softmax
    m = jnp.maximum(l0, l1)
    e0 = jnp.exp(l0 - m)
    e1 = jnp.exp(l1 - m)
    denom = e0 + e1
    # EUP reciprocal + one Newton refinement: keeps the divide off the VALU
    # while retaining full f32 accuracy for the scores.
    inv = pl.reciprocal(denom, approx=True)
    inv = inv * (2.0 - denom * inv)
    s0 = e0 * inv
    s1 = e1 * inv

    # cross entropy per row (mean reduction done in the wrapper)
    lab = lab_ref[...]                                                 # (TN,1) i32
    picked = jnp.where(lab == 1, l1, l0)                               # C == 2 select
    nll = m + jnp.log(denom) - picked                                  # (TN, 1)

    # predLabel = round(softmax)[:, 1]; round-half-even(0.5) == 0, so this is
    # exactly (l1 > l0) -- independent of the approx reciprocal.
    plabel = (l1 > l0).astype(jnp.float32)                             # (TN, 1)
    correct = (plabel == lab.astype(jnp.float32)).astype(jnp.float32)  # (TN, 1)

    # Lane-iota select packing: 5 lane-broadcasts + 5 vreg selects, then one
    # unmasked full-lane store stream (no skinny-column concatenation).
    lane = lax.broadcasted_iota(jnp.int32, (tn, 128), 1)
    out = jnp.where(lane == 0, s0,
          jnp.where(lane == 1, s1,
          jnp.where(lane == 2, plabel,
          jnp.where(lane == 3, nll,
          jnp.where(lane == 4, correct, 0.0)))))
    out_ref[...] = out


def _infer_kernel(x_ref, w_ref, b_ref, n_ref, out_ref):
    """labels is None path: per-block partial sums of logits.
       Output block (8,128): row 0, lanes 0/1 hold sum(l0)/sum(l1) of block."""
    tn = x_ref.shape[0]
    l0, l1 = _logits_2class(x_ref, w_ref, b_ref)
    # mask padded rows (a zero x row would still contribute the bias)
    row = lax.broadcasted_iota(jnp.int32, (tn, 1), 0) + pl.program_id(0) * tn
    valid = (row < n_ref[0]).astype(jnp.float32)
    s0 = jnp.sum(l0 * valid)
    s1 = jnp.sum(l1 * valid)
    sub = lax.broadcasted_iota(jnp.int32, (8, 128), 0)
    lane = lax.broadcasted_iota(jnp.int32, (8, 128), 1)
    out_ref[...] = jnp.where((sub == 0) & (lane == 0), s0,
                             jnp.where((sub == 0) & (lane == 1), s1, 0.0))


# ------------------------------------------------------------------ wrapper

def _row_block(n, target=1024):
    """Rows per grid block: multiple of 16 (valid sublane tiling for bf16/f32)."""
    if n >= target:
        return target
    return max(16, -(-n // 16) * 16)


class LossAV:
    """JAX/Pallas port of the PyTorch `lossAV` module (forward only)."""

    def __init__(self, dim=256, key=jax.random.PRNGKey(0)):
        self.dim = dim
        kw, kb = jax.random.split(key)
        bound = 1.0 / (dim ** 0.5)
        # PyTorch nn.Linear layout: W is (C, D) = (2, dim), b is (2,)
        self.W = jax.random.uniform(kw, (2, dim), jnp.float32, -bound, bound)
        self.b = jax.random.uniform(kb, (2,), jnp.float32, -bound, bound)

    @staticmethod
    def _pad_rows(a, tn):
        n = a.shape[0]
        n_pad = -(-n // tn) * tn
        if n_pad != n:
            a = jnp.pad(a, ((0, n_pad - n),) + ((0, 0),) * (a.ndim - 1))
        return a, n_pad

    def __call__(self, x, labels=None):
        # x: (N, 1, D) -> (N, D).  bf16 input accepted (and preferred: halves
        # the only large HBM->VMEM stream); math is f32 in-kernel.
        x = jnp.squeeze(x, axis=1)
        n, d = x.shape
        tn = _row_block(n)
        x, n_pad = self._pad_rows(x, tn)
        grid = (n_pad // tn,)
        params = pltpu.CompilerParams(dimension_semantics=("parallel",))
        x_bytes = x.size * x.dtype.itemsize

        if labels is None:
            nblk = grid[0]
            cost = pl.CostEstimate(
                flops=4 * n_pad * d,
                transcendentals=0,
                bytes_accessed=x_bytes + nblk * 8 * 128 * 4 + 2 * d * 4)
            out = pl.pallas_call(
                _infer_kernel,
                out_shape=jax.ShapeDtypeStruct((nblk * 8, 128), jnp.float32),
                grid=grid,
                in_specs=[
                    pl.BlockSpec((tn, d), lambda i: (i, 0)),   # x row block
                    pl.BlockSpec((2, d), lambda i: (0, 0)),    # W (resident)
                    _SMEM_SPEC,                                # b  (2,)  SMEM
                    _SMEM_SPEC,                                # n  (1,)  SMEM
                ],
                out_specs=pl.BlockSpec((8, 128), lambda i: (i, 0)),
                compiler_params=params,
                cost_estimate=cost,
            )(x, self.W, self.b, jnp.array([n], jnp.int32))
            partial = out.reshape(nblk, 8, 128)[:, 0, 0:2]     # (nblk, 2)
            return jnp.sum(partial, axis=0) / n                # whole_pre (2,)

        labels2d = jnp.asarray(labels, jnp.int32).reshape(n, 1)
        labels2d, _ = self._pad_rows(labels2d, tn)
        cost = pl.CostEstimate(
            flops=4 * n_pad * d + 24 * n_pad,
            transcendentals=4 * n_pad,
            bytes_accessed=x_bytes + n_pad * (128 + 1) * 4 + 2 * d * 4)
        packed = pl.pallas_call(
            _train_kernel,
            out_shape=jax.ShapeDtypeStruct((n_pad, 128), jnp.float32),
            grid=grid,
            in_specs=[
                pl.BlockSpec((tn, d), lambda i: (i, 0)),       # x row block
                pl.BlockSpec((2, d), lambda i: (0, 0)),        # W (resident)
                _SMEM_SPEC,                                    # b (2,) SMEM
                pl.BlockSpec((tn, 1), lambda i: (i, 0)),       # labels block
            ],
            out_specs=pl.BlockSpec((tn, 128), lambda i: (i, 0)),
            compiler_params=params,
            cost_estimate=cost,
        )(x, self.W, self.b, labels2d)

        packed = packed[:n]                                    # drop padded rows
        pred_score = packed[:, 0:2]                            # (N, 2)
        pred_label = packed[:, 2]                              # (N,)
        nloss = jnp.mean(packed[:, 3])                         # CE, mean reduction
        correct_num = jnp.sum(packed[:, 4])                    # float count
        return nloss, pred_score, pred_label, correct_num


# ------------------------------------------------------------------ main

if __name__ == "__main__":
    N, D = 8, 256
    key = jax.random.PRNGKey(0)
    kx, kl, kp = jax.random.split(key, 3)

    # bf16 activations (kernel math is f32)
    x = jax.random.normal(kx, (N, 1, D), jnp.float32).astype(jnp.bfloat16)
    labels = jax.random.randint(kl, (N,), 0, 2, jnp.int32)

    module = LossAV(dim=D, key=kp)

    # labels == None path
    whole_pre = module(x)
    jax.block_until_ready(whole_pre)
    assert whole_pre.shape == (2,)

    # labels given path
    nloss, pred_score, pred_label, correct_num = module(x, labels)
    jax.block_until_ready((nloss, pred_score, pred_label, correct_num))
    assert nloss.shape == ()
    assert pred_score.shape == (N, 2)
    assert pred_label.shape == (N,)
    assert correct_num.shape == ()

    # plain-JAX reference (same bf16 input, f32 math)
    xf = jnp.squeeze(x, 1).astype(jnp.float32)
    logits_ref = xf @ module.W.T + module.b[None, :]
    score_ref = jax.nn.softmax(logits_ref, axis=-1)
    loss_ref = jnp.mean(-jnp.take_along_axis(jax.nn.log_softmax(logits_ref, -1),
                                             labels[:, None], axis=-1))
    plabel_ref = jnp.round(score_ref)[:, 1]
    correct_ref = jnp.sum((plabel_ref == labels.astype(jnp.float32)).astype(jnp.float32))

    assert jnp.allclose(pred_score, score_ref, atol=1e-4)
    assert jnp.allclose(nloss, loss_ref, atol=1e-4)
    assert jnp.allclose(whole_pre, jnp.mean(logits_ref, axis=0), atol=1e-4)
    assert jnp.array_equal(pred_label, plabel_ref)
    assert jnp.allclose(correct_num, correct_ref)

    print("KERNEL_OK")
</pallas_src>

<mosaic_0001>
module attributes {stable_mosaic.version = 11 : i64} {
  func.func @_infer_kernel(%arg0: i32, %arg1: memref<16x256xbf16, #tpu.memory_space<vmem>>, %arg2: memref<2x256xf32, #tpu.memory_space<vmem>>, %arg3: memref<2xf32, #tpu.memory_space<smem>>, %arg4: memref<1xi32, #tpu.memory_space<smem>>, %arg5: memref<8x128xf32, #tpu.memory_space<vmem>>) attributes {dimension_semantics = [#tpu.dimension_semantics<parallel>], iteration_bounds = array<i64: 1>, scalar_prefetch = 0 : i64, scratch_operands = 0 : i64, tpu.core_type = #tpu.core_type<tc>, window_params = [{transform_indices = @transform_0, window_bounds = array<i64: 16, 256>}, {pipeline_mode = #tpu.pipeline_mode<synchronous>, transform_indices = @transform_1, window_bounds = array<i64: 2, 256>}, {transform_indices = @transform_2, window_bounds = array<i64: 2>}, {transform_indices = @transform_3, window_bounds = array<i64: 1>}, {transform_indices = @transform_4, window_bounds = array<i64: 8, 128>}]} {
    %c0 = arith.constant 0 : index
    %c0_0 = arith.constant 0 : index
    %0 = vector.load %arg1[%c0, %c0_0] : memref<16x256xbf16, #tpu.memory_space<vmem>>, vector<16x256xbf16>
    %1 = arith.extf %0 : vector<16x256xbf16> to vector<16x256xf32>
    %c0_1 = arith.constant 0 : index
    %c0_2 = arith.constant 0 : index
    %2 = vector.load %arg2[%c0_1, %c0_2] : memref<2x256xf32, #tpu.memory_space<vmem>>, vector<2x256xf32>
    %3 = vector.extract_strided_slice %2 {offsets = [0, 0], sizes = [1, 256], strides = [1, 1]} : vector<2x256xf32> to vector<1x256xf32>
    %4 = vector.broadcast %3 : vector<1x256xf32> to vector<16x256xf32>
    %5 = arith.mulf %1, %4 : vector<16x256xf32>
    %cst = arith.constant dense<0.000000e+00> : vector<16xf32>
    %6 = vector.multi_reduction <add>, %5, %cst [1] : vector<16x256xf32> to vector<16xf32>
    %7 = vector.shape_cast %6 : vector<16xf32> to vector<16x1xf32>
    %c0_3 = arith.constant 0 : index
    %8 = memref.load %arg3[%c0_3] : memref<2xf32, #tpu.memory_space<smem>>
    %9 = vector.broadcast %8 : f32 to vector<16x1xf32>
    %10 = arith.addf %7, %9 : vector<16x1xf32>
    %11 = vector.extract_strided_slice %2 {offsets = [1, 0], sizes = [1, 256], strides = [1, 1]} : vector<2x256xf32> to vector<1x256xf32>
    %12 = vector.broadcast %11 : vector<1x256xf32> to vector<16x256xf32>
    %13 = arith.mulf %1, %12 : vector<16x256xf32>
    %cst_4 = arith.constant dense<0.000000e+00> : vector<16xf32>
    %14 = vector.multi_reduction <add>, %13, %cst_4 [1] : vector<16x256xf32> to vector<16xf32>
    %15 = vector.shape_cast %14 : vector<16xf32> to vector<16x1xf32>
    %c1 = arith.constant 1 : index
    %16 = memref.load %arg3[%c1] : memref<2xf32, #tpu.memory_space<smem>>
    %17 = vector.broadcast %16 : f32 to vector<16x1xf32>
    %18 = arith.addf %15, %17 : vector<16x1xf32>
    %19 = tpu.iota {dimensions = array<i32: 0>} : vector<16x1xi32>
    %c16_i32 = arith.constant 16 : i32
    %20 = arith.muli %arg0, %c16_i32 : i32
    %21 = vector.broadcast %20 : i32 to vector<16x1xi32>
    %22 = arith.addi %19, %21 : vector<16x1xi32>
    %c0_5 = arith.constant 0 : index
    %23 = memref.load %arg4[%c0_5] : memref<1xi32, #tpu.memory_space<smem>>
    %24 = vector.broadcast %23 : i32 to vector<16x1xi32>
    %25 = arith.cmpi slt, %22, %24 : vector<16x1xi32>
    %26 = arith.extui %25 : vector<16x1xi1> to vector<16x1xi32>
    %27 = arith.sitofp %26 : vector<16x1xi32> to vector<16x1xf32>
    %28 = arith.mulf %10, %27 : vector<16x1xf32>
    %29 = vector.shape_cast %28 : vector<16x1xf32> to vector<1x16x1xf32>
    %cst_6 = arith.constant dense<0.000000e+00> : vector<1xf32>
    %30 = vector.multi_reduction <add>, %29, %cst_6 [1, 2] : vector<1x16x1xf32> to vector<1xf32>
    %31 = vector.shape_cast %30 : vector<1xf32> to vector<1x1x1xf32>
    %32 = vector.extract %31[0, 0, 0] : f32 from vector<1x1x1xf32>
    %33 = arith.mulf %18, %27 : vector<16x1xf32>
    %34 = vector.shape_cast %33 : vector<16x1xf32> to vector<1x16x1xf32>
    %cst_7 = arith.constant dense<0.000000e+00> : vector<1xf32>
    %35 = vector.multi_reduction <add>, %34, %cst_7 [1, 2] : vector<1x16x1xf32> to vector<1xf32>
    %36 = vector.shape_cast %35 : vector<1xf32> to vector<1x1x1xf32>
    %37 = vector.extract %36[0, 0, 0] : f32 from vector<1x1x1xf32>
    %38 = tpu.iota {dimensions = array<i32: 0>} : vector<8x128xi32>
    %39 = tpu.iota {dimensions = array<i32: 1>} : vector<8x128xi32>
    %c0_i32 = arith.constant 0 : i32
    %40 = vector.broadcast %c0_i32 : i32 to vector<8x128xi32>
    %41 = arith.cmpi eq, %38, %40 : vector<8x128xi32>
    %c0_i32_8 = arith.constant 0 : i32
    %42 = vector.broadcast %c0_i32_8 : i32 to vector<8x128xi32>
    %43 = arith.cmpi eq, %39, %42 : vector<8x128xi32>
    %44 = arith.andi %41, %43 : vector<8x128xi1>
    %c0_i32_9 = arith.constant 0 : i32
    %45 = vector.broadcast %c0_i32_9 : i32 to vector<8x128xi32>
    %46 = arith.cmpi eq, %38, %45 : vector<8x128xi32>
    %c1_i32 = arith.constant 1 : i32
    %47 = vector.broadcast %c1_i32 : i32 to vector<8x128xi32>
    %48 = arith.cmpi eq, %39, %47 : vector<8x128xi32>
    %49 = arith.andi %46, %48 : vector<8x128xi1>
    %cst_10 = arith.constant 0.000000e+00 : f32
    %50 = vector.broadcast %37 : f32 to vector<8x128xf32>
    %51 = vector.broadcast %cst_10 : f32 to vector<8x128xf32>
    %52 = arith.select %49, %50, %51 : vector<8x128xi1>, vector<8x128xf32>
    %53 = vector.broadcast %32 : f32 to vector<8x128xf32>
    %54 = arith.select %44, %53, %52 : vector<8x128xi1>, vector<8x128xf32>
    %c0_11 = arith.constant 0 : index
    %c0_12 = arith.constant 0 : index
    %55 = vector.load %arg5[%c0_11, %c0_12] : memref<8x128xf32, #tpu.memory_space<vmem>>, vector<8x128xf32>
    tpu.vector_store %arg5[%c0_11, %c0_12], %54 {strides = array<i32>} : memref<8x128xf32, #tpu.memory_space<vmem>>, vector<8x128xf32>,
    return
  }
  func.func @transform_0(%arg0: i32) -> (i32, i32) {
    %c0_i32 = arith.constant 0 : i32
    %c0_i32_0 = arith.constant 0 : i32
    return %arg0, %c0_i32 : i32, i32
  }
  func.func @transform_1(%arg0: i32) -> (i32, i32) {
    %c0_i32 = arith.constant 0 : i32
    %c0_i32_0 = arith.constant 0 : i32
    %c0_i32_1 = arith.constant 0 : i32
    return %c0_i32, %c0_i32_0 : i32, i32
  }
  func.func @transform_2(%arg0: i32) -> i32 {
    %c0_i32 = arith.constant 0 : i32
    %c0_i32_0 = arith.constant 0 : i32
    return %c0_i32 : i32
  }
  func.func @transform_3(%arg0: i32) -> i32 {
    %c0_i32 = arith.constant 0 : i32
    %c0_i32_0 = arith.constant 0 : i32
    return %c0_i32 : i32
  }
  func.func @transform_4(%arg0: i32) -> (i32, i32) {
    %c0_i32 = arith.constant 0 : i32
    %c0_i32_0 = arith.constant 0 : i32
    return %arg0, %c0_i32 : i32, i32
  }
}

</mosaic_0001>

<bundles_post_ra>
// kernel: tpu_custom_call.1
= control target key start
LH: loop header
LB: loop body
LE: loop exit
PB: predicated region body
PF: predicated region fallthrough
CT: control target
= control target key end

     0   :  { %10 = vsyncpa [#allocation4], 0  ;;  %s340_s0 = inlined_call_operand.hbm [shape: bf16[16,256], index: 0, kind: input, shape index: {}]   ;;  %s341_s1 = inlined_call_operand.vmem [shape: f32[2,256], index: 1, kind: input, shape index: {}]   ;;  %s342_s2 = inlined_call_operand.vmem [shape: f32[2], index: 2, kind: input, shape index: {}]   ;;  %s343_s3 = inlined_call_operand.<no memory space> [shape: s32[1], index: 3, kind: input, shape index: {}]   ;;  %s344_s4 = inlined_call_operand.hbm [shape: f32[8,128], index: 4, kind: output, shape index: {}]  }
   0x1   :  { %11 = vsyncpa [#allocation6], 0 }
   0x2   :  { %12 = vsyncpa [#allocation5], 0  ;;  %s265_s15 = smov [#allocation3]   ;;  %s33_s19 = sshll.u32 %s342_s2, 4  ;;  %s34_s19 = int_to_ptr.vmem [resolvable:$true] %s33_s19 }
   0x3   :  { %s18_s16 = sshll.u32 %s265_s15, 4  ;;  %s203_s22 = scalar_lea.hbm %s340_s0, 256  ;;  %s19_s16 = int_to_ptr.vmem [resolvable:$true] %s18_s16 }
   0x4   :  { %p204_p0 = scmp.ne.s32.totalorder %s340_s0, %s203_s22  ;;  %p207_p1 = scmp.lt.u32.totalorder %s203_s22, %s340_s0 }
   0x6   :  { %p209_p2 = pnand %p207_p1, %p204_p0 }
   0x8   :  { %212 = shalt.err (!%p209_p2)
}
   0x9   :  { %s213_s27 = scalar_lea.vmem %s19_s16, 256  ;;  %p218_p4 = scmp.lt.s32.totalorder %s19_s16, %s19_s16 }
   0xa   :  { %p214_p3 = scmp.ne.s32.totalorder %s19_s16, %s213_s27  ;;  %p219_p5 = scmp.lt.s32.totalorder %s213_s27, %s213_s27 }
   0xc   :  { %p220_p6 = por %p219_p5, %p218_p4 }
   0xe   :  { %p221_p7 = pnand %p220_p6, %p214_p3 }
  0x10   :  { %224 = shalt.err (!%p221_p7)
}
  0x11   :  { %s266_s2 = smov 128   ;;  %s267_s28 = smov 8  }
  0x12   :  { %24 = dma.hbm_to_vmem [thread:$0]  %s340_s0, 256, %s19_s16, [#allocation4], %s266_s2, %s266_s2, %s267_s28  }
  0x13   :  { %s225_s5 = scalar_lea.vmem %s34_s19, 16  ;;  %p230_p9 = scmp.lt.s32.totalorder %s34_s19, %s34_s19 }
  0x14   :  { %p226_p8 = scmp.ne.s32.totalorder %s34_s19, %s225_s5  ;;  %p231_p10 = scmp.lt.s32.totalorder %s225_s5, %s225_s5 }
  0x16   :  { %p232_p11 = por %p231_p10, %p230_p9 }
  0x18   :  { %p233_p12 = pnand %p232_p11, %p226_p8 }
  0x1a   :  { %236 = shalt.err (!%p233_p12)
}
  0x1b   :  { %s268_s6 = smov [#allocation7]  }
  0x1c   :  { %36 = dma.vmem_to_smem %s34_s19, 16, %s268_s6, [#allocation6]  }
  0x1d   :  { %259 = dma.done.wait [#allocation4], 256  }
  0x1e   :  { %260 = vsyncadd [#allocation4], 4294967040 }
  0x1f   :  { %261 = dma.done.wait [#allocation6], 16  }
  0x20   :  { %262 = vsyncadd [#allocation6], 4294967280 }
  0x21   :  { %45 = sfence }
  0x22   :  { %v54_v0 = vlaneseq  ;;  %v46_v1 = vld [vmem:[#allocation3] sm:$0xff]  ;;  %v47_v8 = vld [vmem:[#allocation3 + $0x8] sm:$0xff]  ;;  %s82_s8 = sld [smem:[#allocation7]]  ;;  %v126_v33 = vstv %s343_s3  ;;  %v269_v41 = vmov 0.0   ;;  %vm135_vm2 = vcmask 7168   ;;  %s270_s11 = smov [#allocation8]  }
  0x23   :  { %v52_v3 = vld [vmem:[%s341_s1] sm:$0xf]  ;;  %v48_v9 = vunpack.c.l.bf16 %v46_v1  ;;  %v49_v10 = vunpack.c.h.bf16 %v46_v1  ;;  %v50_v15 = vunpack.c.l.bf16 %v47_v8  ;;  %v51_v16 = vunpack.c.h.bf16 %v47_v8  ;;  %s190_s1 = sld [smem:[#allocation7 + $0x1]]  ;;  %s180_s12 = sshll.u32 %s270_s11, 4  ;;  %s181_s12 = int_to_ptr.vmem [resolvable:$true] %s180_s12 }
  0x24   :  { %v312_v2 = vshrl.u32 %v54_v0, 7  ;;  %s237_s14 = scalar_lea.vmem %s181_s12, 128  ;;  %p242_p0 = scmp.lt.s32.totalorder %s181_s12, %s181_s12 }
  0x25   :  { %p238_p13 = scmp.ne.s32.totalorder %s181_s12, %s237_s14  ;;  %p243_p1 = scmp.lt.s32.totalorder %s237_s14, %s237_s14 }
  0x26   :  { %v88_v4 = vsub.s32 1, %v312_v2  ;;  %v92_v5 = vsub.s32 3, %v312_v2  ;;  %v56_v6 = vsub.s32 0, %v312_v2  ;;  %v60_v7 = vsub.s32 2, %v312_v2 }
  0x27   :  { %v120_v34 = vadd.s32 8, %v312_v2  ;;  %vm127_vm0 = vcmp.lt.s32.totalorder %v312_v2, %v126_v33  ;;  %vm164_vm3 = vcmp.eq.s32.totalorder %v312_v2, 0  ;;  %p244_p2 = por %p243_p1, %p242_p0 }
  0x28   :  { %v89_v11 = vrot.slane %v52_v3, %v88_v4  ;;  %v93_v12 = vrot.slane %v52_v3, %v92_v5  ;;  %v57_v13 = vrot.slane %v52_v3, %v56_v6  ;;  %v61_v14 = vrot.slane %v52_v3, %v60_v7 }
  0x29   :  { %v115_v35 = vstv %s190_s1  ;;  %v83_v36 = vstv %s82_s8  ;;  %vm128_vm1 = vcmp.lt.s32.totalorder %v120_v34, %v126_v33  ;;  %v191_v42 = vsel %vm127_vm0, 1.0, %v269_v41  ;;  %p245_p3 = pnand %p244_p2, %p238_p13 }
  0x2a   :  { %v99_v17 = vrot.slane %v89_v11, %v88_v4  ;;  %v103_v18 = vrot.slane %v93_v12, %v88_v4  ;;  %v67_v19 = vrot.slane %v57_v13, %v56_v6  ;;  %v71_v20 = vrot.slane %v61_v14, %v56_v6 }
  0x2b   :  { %v192_v43 = vsel %vm128_vm1, 1.0, %v269_v41 }
  0x2c   :  { %v104_v21 = vmul.f32 %v99_v17, %v48_v9  ;;  %v105_v22 = vmul.f32 %v103_v18, %v49_v10  ;;  %v72_v23 = vmul.f32 %v67_v19, %v48_v9  ;;  %v73_v24 = vmul.f32 %v71_v20, %v49_v10 }
  0x2d   :  { %v106_v25 = vmul.f32 %v99_v17, %v50_v15  ;;  %v107_v26 = vmul.f32 %v103_v18, %v51_v16  ;;  %v74_v27 = vmul.f32 %v67_v19, %v50_v15  ;;  %v75_v28 = vmul.f32 %v71_v20, %v51_v16 }
  0x2e   :  { %v108_v29 = vadd.f32 %v105_v22, %v104_v21  ;;  %v76_v30 = vadd.f32 %v73_v24, %v72_v23  ;;  %v163_v10 = vand.u32 127, %v54_v0 }
  0x2f   :  { %v111_v31 = vadd.f32 %v107_v26, %v106_v25  ;;  %v79_v32 = vadd.f32 %v75_v28, %v74_v27 }
  0x30   :  { %109 = vadd.xlane.f32.xlu1 %v108_v29  ;;  %77 = vadd.xlane.f32.xlu0 %v76_v30  ;;  %vm167_vm4 = vcmp.eq.s32.totalorder %v163_v10, 1  ;;  %vm165_vm5 = vcmp.eq.s32.totalorder %v163_v10, 0 }
  0x31   :  { %vm168_vm6 = vmand %vm164_vm3, %vm167_vm4 }
  0x32   :  { %vm166_vm7 = vmand %vm164_vm3, %vm165_vm5 }
  0x34   :  { %112 = vadd.xlane.f32.xlu1 %v111_v31  ;;  %80 = vadd.xlane.f32.xlu0 %v79_v32 }
  0xbd   :  { %v110_v37 = vpop.xlane.xlu1 %109  ;;  %v78_v38 = vpop.xlane.xlu0 %77 }
  0xbe   :  { %v116_v39 = vadd.f32 %v115_v35, %v110_v37  ;;  %v84_v40 = vadd.f32 %v83_v36, %v78_v38 }
  0xc0   :  { %v148_v46 = vmul.f32 %v191_v42, %v116_v39  ;;  %v133_v47 = vmul.f32 %v191_v42, %v84_v40 }
  0xc1   :  { %v113_v44 = vpop.xlane.xlu1 %112  ;;  %v81_v45 = vpop.xlane.xlu0 %80 }
  0xc2   :  { %v117_v48 = vadd.f32 %v115_v35, %v113_v44  ;;  %v85_v49 = vadd.f32 %v83_v36, %v81_v45  ;;  %v150_v52 = vsel %vm135_vm2, %v148_v46, 0.0  ;;  %v136_v54 = vsel %vm135_vm2, %v133_v47, 0.0 }
  0xc4   :  { %v149_v50 = vmul.f32 %v192_v43, %v117_v48  ;;  %v134_v51 = vmul.f32 %v192_v43, %v85_v49 }
  0xc6   :  { %v151_v53 = vsel %vm135_vm2, %v149_v50, 0.0  ;;  %v137_v55 = vsel %vm135_vm2, %v134_v51, 0.0 }
  0xc7   :  { %v152_v56 = vadd.f32 %v151_v53, %v150_v52  ;;  %v138_v57 = vadd.f32 %v137_v55, %v136_v54 }
  0xc9   :  { %153 = vadd.xlane.f32.xlu1 %v152_v56  ;;  %139 = vadd.xlane.f32.xlu0 %v138_v57 }
 0x156   :  { %v154_v58 = vpop.xlane.xlu1 %153  ;;  %v140_v59 = vpop.xlane.xlu0 %139 }
 0x157   :  { %v155_v60 = vrot.slane %v154_v58, 4  ;;  %v141_v61 = vrot.slane %v140_v59, 4 }
 0x159   :  { %v156_v62 = vadd.f32 %v155_v60, %v154_v58  ;;  %v142_v63 = vadd.f32 %v141_v61, %v140_v59 }
 0x15b   :  { %v157_v1 = vrot.slane %v156_v62, 2  ;;  %v143_v3 = vrot.slane %v142_v63, 2 }
 0x15d   :  { %v158_v4 = vadd.f32 %v157_v1, %v156_v62  ;;  %v144_v5 = vadd.f32 %v143_v3, %v142_v63 }
 0x15f   :  { %v145_v6 = vrot.slane %v144_v5, 1  ;;  %v159_v7 = vrot.slane %v158_v4, 1 }
 0x161   :  { %v146_v8 = vadd.f32 %v145_v6, %v144_v5  ;;  %v160_v9 = vadd.f32 %v159_v7, %v158_v4 }
 0x163   :  { %193 = vpush %v146_v8 }
 0x164   :  { %195 = vpush %v160_v9 }
 0x194   :  { %s194_s3 = spop %193 }
 0x195   :  { %v171_v11 = vstv %s194_s3  ;;  %s196_s13 = spop %195 }
 0x196   :  { %v169_v12 = vstv %s196_s13 }
 0x197   :  { %v170_v13 = vsel %vm168_vm6, %v169_v12, 0.0 }
 0x198   :  { %v172_v14 = vsel %vm166_vm7, %v171_v11, %v170_v13 }
 0x199   :  { %173 = vst [vmem:[#allocation8] sm:$0xff] %v172_v14 }
 0x19a   :  { %248 = shalt.err (!%p245_p3)
}
 0x19b   :  { %s249_s17 = scalar_lea.hbm %s344_s4, 128 }
 0x19c   :  { %p250_p4 = scmp.ne.s32.totalorder %s344_s4, %s249_s17  ;;  %p253_p5 = scmp.lt.u32.totalorder %s249_s17, %s344_s4 }
 0x19e   :  { %p255_p6 = pnand %p253_p5, %p250_p4 }
 0x1a0   :  { %258 = shalt.err (!%p255_p6)
}
 0x1a1   :  { %183 = dma.vmem_to_hbm [thread:$0]  %s181_s12, 128, %s344_s4, [#allocation5]  }
 0x1a2   :  { %263 = dma.done.wait [#allocation5], 128  }
 0x1a3   :  { %264 = vsyncadd [#allocation5], 4294967168 }
 0x1a4   :  { %187 = vsyncpa [#allocation4], 1 }
 0x1a5   :  { %188 = vsyncpa [#allocation5], 1 }
 0x1a6   :  { %189 = vsyncpa [#allocation6], 1 }

</bundles_post_ra>
